<compile_context>
chip_gen: v7x
topology: tpu7x:2x2x1
jax: 0.10.0
libtpu: 0.0.40
codegen_flags: <defaults>
</compile_context>

<pallas_src>
import jax
import jax.numpy as jnp
from jax.experimental import pallas as pl
from jax.experimental.pallas import tpu as pltpu

BN_EPS = 1e-5


# --------------------------------------------------------------------------- #
# Kernels
# --------------------------------------------------------------------------- #
def _fc_kernel_single(x_ref, w1_ref, b1_ref, w2_ref, b2_ref, o_ref):
    """Whole hidden dim in one tile: matmul -> bias+ReLU -> matmul -> bias."""
    x = x_ref[...].astype(jnp.bfloat16)
    h = jnp.dot(x, w1_ref[...], preferred_element_type=jnp.float32)
    h = jnp.maximum(h + b1_ref[...], 0.0)          # Dropout = identity (eval)
    out = jnp.dot(h.astype(jnp.bfloat16), w2_ref[...],
                  preferred_element_type=jnp.float32)
    o_ref[...] = (out + b2_ref[...]).astype(o_ref.dtype)


def _fc_kernel_tiled(x_ref, w1_ref, b1_ref, w2_ref, b2_ref, o_ref):
    """Hidden dim tiled along grid axis 1; accumulate directly into o_ref
    (its block index is constant across k, so the block stays VMEM-resident)."""
    k = pl.program_id(1)

    x = x_ref[...].astype(jnp.bfloat16)
    h = jnp.dot(x, w1_ref[...], preferred_element_type=jnp.float32)
    h = jnp.maximum(h + b1_ref[...], 0.0)          # Dropout = identity (eval)
    partial = jnp.dot(h.astype(jnp.bfloat16), w2_ref[...],
                      preferred_element_type=jnp.float32)

    @pl.when(k == 0)
    def _():
        o_ref[...] = partial

    @pl.when(k > 0)
    def _():
        o_ref[...] += partial

    @pl.when(k == pl.num_programs(1) - 1)
    def _():
        o_ref[...] += b2_ref[...]


# --------------------------------------------------------------------------- #
# Host-side helpers
# --------------------------------------------------------------------------- #
def _round_up(v, m):
    return ((v + m - 1) // m) * m


def _vmem_capacity_bytes():
    try:
        return int(pltpu.get_tpu_info().vmem_capacity_bytes)
    except Exception:
        return 64 * 1024 * 1024     # conservative (v7x-sized) fallback


def _footprint_bytes(tm, th, d_in_p, d_out_p):
    """Rough double-buffered working set for the tiled kernel."""
    x_b = 2 * tm * d_in_p * 4          # x tile, f32, double-buffered
    w1_b = 2 * d_in_p * th * 2         # w1 slice, bf16
    w2_b = 2 * th * d_out_p * 2        # w2 slice, bf16
    bias = 2 * (th + d_out_p) * 4      # b1/b2, f32
    out_b = 2 * tm * d_out_p * 4       # resident output block, f32
    return x_b + w1_b + w2_b + bias + out_b


def prepare_params(params, *, th_max=512, tm_max=256):
    """One-time preprocessing: fold eval-mode BatchNorm1d into the second
    linear, pad weights/biases to MXU/lane-friendly shapes and cast to bf16.
    Call once; reuse the result across forward calls."""
    (w1, b1, gamma, beta, run_mean, run_var, w2, b2) = params
    d_in, h_dim = w1.shape
    d_out = w2.shape[1]

    # BN(h) = h*scale + shift  =>  BN(h) @ w2 + b2 = h @ (w2*scale^T) + (shift @ w2 + b2)
    scale = gamma * jax.lax.rsqrt(run_var + BN_EPS)   # (1, H)
    shift = beta - run_mean * scale                   # (1, H)
    w2_eff = w2 * scale.T                             # (H, D_out)
    b2_eff = b2 + shift @ w2                          # (1, D_out)

    d_in_p = _round_up(d_in, 128)
    d_out_p = _round_up(d_out, 128)

    # Hidden tile: keep it large; pad h up to a multiple of it (never shrink
    # to 128 because of an awkward hidden size).  Shrink only if the estimated
    # VMEM working set would not fit this generation's budget.
    vmem_budget = int(0.7 * _vmem_capacity_bytes())
    th = min(th_max, _round_up(h_dim, 128))
    while th > 128 and _footprint_bytes(tm_max, th, d_in_p, d_out_p) > vmem_budget:
        th -= 128
    h_p = _round_up(h_dim, th)

    w1_p = jnp.zeros((d_in_p, h_p), jnp.bfloat16).at[:d_in, :h_dim].set(
        w1.astype(jnp.bfloat16))
    b1_p = jnp.zeros((1, h_p), jnp.float32).at[:, :h_dim].set(b1)
    w2_p = jnp.zeros((h_p, d_out_p), jnp.bfloat16).at[:h_dim, :d_out].set(
        w2_eff.astype(jnp.bfloat16))
    b2_p = jnp.zeros((1, d_out_p), jnp.float32).at[:, :d_out].set(b2_eff)

    meta = dict(d_in=d_in, d_out=d_out, d_in_p=d_in_p, d_out_p=d_out_p,
                h_p=h_p, th=th, tm_max=tm_max)
    return (w1_p, b1_p, w2_p, b2_p), meta


def fullyconnect(x, prepared):
    (w1_p, b1_p, w2_p, b2_p), meta = prepared
    n, d_in = x.shape
    assert d_in == meta["d_in"]
    d_in_p, d_out_p = meta["d_in_p"], meta["d_out_p"]
    h_p, th, d_out = meta["h_p"], meta["th"], meta["d_out"]

    # Batch tile: multiples of 16 (bf16 sublane packing), capped at 256
    # (256-wide MXU on v6e/v7x); >256 batches get >=2 "parallel" tiles for
    # megacore sharding on v7x.
    tm = min(meta["tm_max"], _round_up(n, 16))
    n_p = _round_up(n, tm)

    # Pass x straight through (f32, cast in-kernel) unless padding is needed.
    if (n_p, d_in_p) != (n, d_in):
        x_in = jnp.zeros((n_p, d_in_p), x.dtype).at[:n, :d_in].set(x)
    else:
        x_in = x

    vmem_limit = min(int(0.85 * _vmem_capacity_bytes()), 100 * 1024 * 1024)

    batch_tiles = n_p // tm
    k_tiles = h_p // th

    if k_tiles == 1:
        kernel = _fc_kernel_single
        grid = (batch_tiles,)
        in_specs = [
            pl.BlockSpec((tm, d_in_p),     lambda i: (i, 0)),   # x tile
            pl.BlockSpec((d_in_p, h_p),    lambda i: (0, 0)),   # w1 (resident)
            pl.BlockSpec((1, h_p),         lambda i: (0, 0)),   # b1
            pl.BlockSpec((h_p, d_out_p),   lambda i: (0, 0)),   # w2 (BN folded)
            pl.BlockSpec((1, d_out_p),     lambda i: (0, 0)),   # b2 (BN folded)
        ]
        out_specs = pl.BlockSpec((tm, d_out_p), lambda i: (i, 0))
        dims = ("parallel",)
    else:
        kernel = _fc_kernel_tiled
        grid = (batch_tiles, k_tiles)
        in_specs = [
            pl.BlockSpec((tm, d_in_p),     lambda i, k: (i, 0)),  # x tile
            pl.BlockSpec((d_in_p, th),     lambda i, k: (0, k)),  # w1 slice
            pl.BlockSpec((1, th),          lambda i, k: (0, k)),  # b1 slice
            pl.BlockSpec((th, d_out_p),    lambda i, k: (k, 0)),  # w2 slice
            pl.BlockSpec((1, d_out_p),     lambda i, k: (0, 0)),  # b2
        ]
        out_specs = pl.BlockSpec((tm, d_out_p), lambda i, k: (i, 0))
        dims = ("parallel", "arbitrary")

    out = pl.pallas_call(
        kernel,
        out_shape=jax.ShapeDtypeStruct((n_p, d_out_p), jnp.float32),
        grid_spec=pltpu.PrefetchScalarGridSpec(
            num_scalar_prefetch=0,
            grid=grid,
            in_specs=in_specs,
            out_specs=out_specs,
        ),
        compiler_params=pltpu.CompilerParams(
            dimension_semantics=dims,
            vmem_limit_bytes=vmem_limit),
    )(x_in, w1_p, b1_p, w2_p, b2_p)

    if (n_p, d_out_p) != (n, d_out):
        out = out[:n, :d_out]
    return out


# --------------------------------------------------------------------------- #
# Test harness
# --------------------------------------------------------------------------- #
def init_params(key, input_dim, output_dim):
    hidden_dim = input_dim * 4
    k1, k2, k3, k4, k5, k6, k7, k8 = jax.random.split(key, 8)

    # PyTorch Linear default init: U(-1/sqrt(fan_in), 1/sqrt(fan_in)).
    lim1 = 1.0 / jnp.sqrt(input_dim)
    w1 = jax.random.uniform(k1, (input_dim, hidden_dim), jnp.float32, -lim1, lim1)
    b1 = jax.random.uniform(k2, (1, hidden_dim), jnp.float32, -lim1, lim1)

    lim2 = 1.0 / jnp.sqrt(hidden_dim)
    w2 = jax.random.uniform(k3, (hidden_dim, output_dim), jnp.float32, -lim2, lim2)
    b2 = jax.random.uniform(k4, (1, output_dim), jnp.float32, -lim2, lim2)

    # BatchNorm1d params / running stats (perturbed so the BN path is exercised).
    gamma = 1.0 + 0.1 * jax.random.normal(k5, (1, hidden_dim), jnp.float32)
    beta = 0.1 * jax.random.normal(k6, (1, hidden_dim), jnp.float32)
    run_mean = 0.05 * jax.random.normal(k7, (1, hidden_dim), jnp.float32)
    run_var = 1.0 + 0.1 * jax.random.uniform(k8, (1, hidden_dim), jnp.float32)

    return (w1, b1, gamma, beta, run_mean, run_var, w2, b2)


def reference(x, params):
    (w1, b1, gamma, beta, run_mean, run_var, w2, b2) = params
    h = x @ w1 + b1
    h = jnp.maximum(h, 0.0)
    h = (h - run_mean) / jnp.sqrt(run_var + BN_EPS) * gamma + beta
    return h @ w2 + b2


if __name__ == "__main__":
    batch, input_dim, output_dim = 8, 32, 16

    key = jax.random.PRNGKey(0)
    kx, kp = jax.random.split(key)
    x = jax.random.normal(kx, (batch, input_dim), jnp.float32)
    params = init_params(kp, input_dim, output_dim)

    # One-time weight preparation (BN fold + pad + bf16 cast), reused per call.
    prepared = prepare_params(params)

    out = fullyconnect(x, prepared)
    out = jax.block_until_ready(out)

    ref = reference(x, params)
    assert out.shape == (batch, output_dim)
    max_err = float(jnp.max(jnp.abs(out - ref)))
    assert jnp.allclose(out, ref, atol=2e-2, rtol=2e-2), (
        f"mismatch vs JAX reference (max abs err {max_err})")

    # TODO(synk): training-mode Dropout (stochastic masks) and batch-statistic
    # BatchNorm are not implemented; eval-mode semantics are used.
    print("KERNEL_OK")
</pallas_src>

<mosaic_0001>
module attributes {stable_mosaic.version = 11 : i64} {
  func.func @_fc_kernel_single(%arg0: i32, %arg1: memref<16x128xf32, #tpu.memory_space<vmem>>, %arg2: memref<128x128xbf16, #tpu.memory_space<vmem>>, %arg3: memref<1x128xf32, #tpu.memory_space<vmem>>, %arg4: memref<128x128xbf16, #tpu.memory_space<vmem>>, %arg5: memref<1x128xf32, #tpu.memory_space<vmem>>, %arg6: memref<16x128xf32, #tpu.memory_space<vmem>>) attributes {dimension_semantics = [#tpu.dimension_semantics<parallel>], iteration_bounds = array<i64: 1>, scalar_prefetch = 0 : i64, scratch_operands = 0 : i64, tpu.core_type = #tpu.core_type<tc>, window_params = [{transform_indices = @transform_0, window_bounds = array<i64: 16, 128>}, {pipeline_mode = #tpu.pipeline_mode<synchronous>, transform_indices = @transform_1, window_bounds = array<i64: 128, 128>}, {pipeline_mode = #tpu.pipeline_mode<synchronous>, transform_indices = @transform_2, window_bounds = array<i64: 1, 128>}, {pipeline_mode = #tpu.pipeline_mode<synchronous>, transform_indices = @transform_3, window_bounds = array<i64: 128, 128>}, {pipeline_mode = #tpu.pipeline_mode<synchronous>, transform_indices = @transform_4, window_bounds = array<i64: 1, 128>}, {transform_indices = @transform_5, window_bounds = array<i64: 16, 128>}]} {
    %c0 = arith.constant 0 : index
    %c0_0 = arith.constant 0 : index
    %0 = vector.load %arg1[%c0, %c0_0] : memref<16x128xf32, #tpu.memory_space<vmem>>, vector<16x128xf32>
    %1 = arith.truncf %0 : vector<16x128xf32> to vector<16x128xbf16>
    %c0_1 = arith.constant 0 : index
    %c0_2 = arith.constant 0 : index
    %2 = vector.load %arg2[%c0_1, %c0_2] : memref<128x128xbf16, #tpu.memory_space<vmem>>, vector<128x128xbf16>
    %cst = arith.constant dense<0.000000e+00> : vector<16x128xf32>
    %3 = tpu.matmul %1, %2, %cst {dimension_numbers = #tpu.dot_dimension_numbers<[1], [0], [0], [1], [0, 0, 1, 1], [], []>} : vector<16x128xbf16>, vector<128x128xbf16>, vector<16x128xf32> -> vector<16x128xf32>
    %c0_3 = arith.constant 0 : index
    %c0_4 = arith.constant 0 : index
    %4 = vector.load %arg3[%c0_3, %c0_4] : memref<1x128xf32, #tpu.memory_space<vmem>>, vector<1x128xf32>
    %5 = vector.broadcast %4 : vector<1x128xf32> to vector<16x128xf32>
    %6 = arith.addf %3, %5 : vector<16x128xf32>
    %cst_5 = arith.constant 0.000000e+00 : f32
    %7 = vector.broadcast %cst_5 : f32 to vector<16x128xf32>
    %8 = arith.maximumf %6, %7 : vector<16x128xf32>
    %9 = arith.truncf %8 : vector<16x128xf32> to vector<16x128xbf16>
    %c0_6 = arith.constant 0 : index
    %c0_7 = arith.constant 0 : index
    %10 = vector.load %arg4[%c0_6, %c0_7] : memref<128x128xbf16, #tpu.memory_space<vmem>>, vector<128x128xbf16>
    %cst_8 = arith.constant dense<0.000000e+00> : vector<16x128xf32>
    %11 = tpu.matmul %9, %10, %cst_8 {dimension_numbers = #tpu.dot_dimension_numbers<[1], [0], [0], [1], [0, 0, 1, 1], [], []>} : vector<16x128xbf16>, vector<128x128xbf16>, vector<16x128xf32> -> vector<16x128xf32>
    %c0_9 = arith.constant 0 : index
    %c0_10 = arith.constant 0 : index
    %12 = vector.load %arg5[%c0_9, %c0_10] : memref<1x128xf32, #tpu.memory_space<vmem>>, vector<1x128xf32>
    %13 = vector.broadcast %12 : vector<1x128xf32> to vector<16x128xf32>
    %14 = arith.addf %11, %13 : vector<16x128xf32>
    %c0_11 = arith.constant 0 : index
    %c0_12 = arith.constant 0 : index
    %15 = vector.load %arg6[%c0_11, %c0_12] : memref<16x128xf32, #tpu.memory_space<vmem>>, vector<16x128xf32>
    tpu.vector_store %arg6[%c0_11, %c0_12], %14 {strides = array<i32>} : memref<16x128xf32, #tpu.memory_space<vmem>>, vector<16x128xf32>,
    return
  }
  func.func @transform_0(%arg0: i32) -> (i32, i32) {
    %c0_i32 = arith.constant 0 : i32
    %c0_i32_0 = arith.constant 0 : i32
    return %arg0, %c0_i32 : i32, i32
  }
  func.func @transform_1(%arg0: i32) -> (i32, i32) {
    %c0_i32 = arith.constant 0 : i32
    %c0_i32_0 = arith.constant 0 : i32
    %c0_i32_1 = arith.constant 0 : i32
    return %c0_i32, %c0_i32_0 : i32, i32
  }
  func.func @transform_2(%arg0: i32) -> (i32, i32) {
    %c0_i32 = arith.constant 0 : i32
    %c0_i32_0 = arith.constant 0 : i32
    %c0_i32_1 = arith.constant 0 : i32
    return %c0_i32, %c0_i32_0 : i32, i32
  }
  func.func @transform_3(%arg0: i32) -> (i32, i32) {
    %c0_i32 = arith.constant 0 : i32
    %c0_i32_0 = arith.constant 0 : i32
    %c0_i32_1 = arith.constant 0 : i32
    return %c0_i32, %c0_i32_0 : i32, i32
  }
  func.func @transform_4(%arg0: i32) -> (i32, i32) {
    %c0_i32 = arith.constant 0 : i32
    %c0_i32_0 = arith.constant 0 : i32
    %c0_i32_1 = arith.constant 0 : i32
    return %c0_i32, %c0_i32_0 : i32, i32
  }
  func.func @transform_5(%arg0: i32) -> (i32, i32) {
    %c0_i32 = arith.constant 0 : i32
    %c0_i32_0 = arith.constant 0 : i32
    return %arg0, %c0_i32 : i32, i32
  }
}

</mosaic_0001>

<bundles_post_ra>
// kernel: tpu_custom_call.1
= control target key start
LH: loop header
LB: loop body
LE: loop exit
PB: predicated region body
PF: predicated region fallthrough
CT: control target
= control target key end

     0   :  { %10 = vsyncpa [#allocation3], 0  ;;  %s615_s0 = inlined_call_operand.hbm [shape: f32[16,128], index: 0, kind: input, shape index: {}]   ;;  %s616_s1 = inlined_call_operand.hbm [shape: bf16[128,128], index: 1, kind: input, shape index: {}]   ;;  %s617_s2 = inlined_call_operand.vmem [shape: f32[1,128], index: 2, kind: input, shape index: {}]   ;;  %s618_s3 = inlined_call_operand.hbm [shape: bf16[128,128], index: 3, kind: input, shape index: {}]   ;;  %s619_s4 = inlined_call_operand.vmem [shape: f32[1,128], index: 4, kind: input, shape index: {}]   ;;  %s620_s5 = inlined_call_operand.hbm [shape: f32[16,128], index: 5, kind: output, shape index: {}]  }
   0x1   :  { %11 = vsyncpa [#allocation6], 0 }
   0x2   :  { %12 = vsyncpa [#allocation4], 0  ;;  %s509_s18 = smov [#allocation5]   ;;  %s415_s22 = scalar_lea.hbm %s616_s1, 1024 }
   0x3   :  { %s30_s19 = sshll.u32 %s509_s18, 4  ;;  %p416_p0 = scmp.ne.s32.totalorder %s616_s1, %s415_s22  ;;  %s31_s19 = int_to_ptr.vmem [resolvable:$true] %s30_s19 }
   0x4   :  { %p419_p1 = scmp.lt.u32.totalorder %s415_s22, %s616_s1 }
   0x6   :  { %p421_p2 = pnand %p419_p1, %p416_p0 }
   0x8   :  { %424 = shalt.err (!%p421_p2)
}
   0x9   :  { %s425_s27 = scalar_lea.vmem %s31_s19, 1024  ;;  %p430_p4 = scmp.lt.s32.totalorder %s31_s19, %s31_s19 }
   0xa   :  { %p426_p3 = scmp.ne.s32.totalorder %s31_s19, %s425_s27  ;;  %p431_p5 = scmp.lt.s32.totalorder %s425_s27, %s425_s27 }
   0xc   :  { %p432_p6 = por %p431_p5, %p430_p4 }
   0xe   :  { %p433_p7 = pnand %p432_p6, %p426_p3 }
  0x10   :  { %436 = shalt.err (!%p433_p7)
}
  0x11   :  { %s510_s28 = smov 64   ;;  %s511_s29 = smov 4  }
  0x12   :  { %36 = dma.hbm_to_vmem [thread:$0]  %s616_s1, 1024, %s31_s19, [#allocation6], %s510_s28, %s510_s28, %s511_s29  }
  0x13   :  { %s512_s7 = smov [#allocation2]   ;;  %s437_s11 = scalar_lea.hbm %s615_s0, 256 }
  0x14   :  { %s18_s8 = sshll.u32 %s512_s7, 4  ;;  %p438_p8 = scmp.ne.s32.totalorder %s615_s0, %s437_s11  ;;  %s19_s8 = int_to_ptr.vmem [resolvable:$true] %s18_s8 }
  0x15   :  { %p441_p9 = scmp.lt.u32.totalorder %s437_s11, %s615_s0 }
  0x17   :  { %p443_p10 = pnand %p441_p9, %p438_p8 }
  0x19   :  { %446 = shalt.err (!%p443_p10)
}
  0x1a   :  { %s447_s16 = scalar_lea.vmem %s19_s8, 256  ;;  %p452_p12 = scmp.lt.s32.totalorder %s19_s8, %s19_s8 }
  0x1b   :  { %p448_p11 = scmp.ne.s32.totalorder %s19_s8, %s447_s16  ;;  %p453_p13 = scmp.lt.s32.totalorder %s447_s16, %s447_s16 }
  0x1d   :  { %p454_p0 = por %p453_p13, %p452_p12 }
  0x1f   :  { %p455_p1 = pnand %p454_p0, %p448_p11 }
  0x21   :  { %458 = shalt.err (!%p455_p1)
}
  0x22   :  { %s513_s1 = smov 128   ;;  %s514_s17 = smov 8  }
  0x23   :  { %24 = dma.hbm_to_vmem [thread:$0]  %s615_s0, 256, %s19_s8, [#allocation3], %s513_s1, %s513_s1, %s514_s17  }
  0x24   :  { %s515_s20 = smov [#allocation7]   ;;  %s459_s24 = scalar_lea.hbm %s618_s3, 1024 }
  0x25   :  { %s44_s21 = sshll.u32 %s515_s20, 4  ;;  %p460_p2 = scmp.ne.s32.totalorder %s618_s3, %s459_s24  ;;  %s45_s21 = int_to_ptr.vmem [resolvable:$true] %s44_s21 }
  0x26   :  { %p463_p3 = scmp.lt.u32.totalorder %s459_s24, %s618_s3 }
  0x28   :  { %p465_p4 = pnand %p463_p3, %p460_p2 }
  0x2a   :  { %468 = shalt.err (!%p465_p4)
}
  0x2b   :  { %s469_s6 = scalar_lea.vmem %s45_s21, 1024  ;;  %p474_p6 = scmp.lt.s32.totalorder %s45_s21, %s45_s21 }
  0x2c   :  { %p470_p5 = scmp.ne.s32.totalorder %s45_s21, %s469_s6  ;;  %p475_p7 = scmp.lt.s32.totalorder %s469_s6, %s469_s6 }
  0x2e   :  { %p476_p8 = por %p475_p7, %p474_p6 }
  0x30   :  { %p477_p9 = pnand %p476_p8, %p470_p5 }
  0x32   :  { %480 = shalt.err (!%p477_p9)
}
  0x33   :  { %50 = dma.hbm_to_vmem [thread:$0]  %s618_s3, 1024, %s45_s21, [#allocation6], %s510_s28, %s510_s28, %s511_s29  }
  0x34   :  { %503 = dma.done.wait [#allocation3], 256  }
  0x35   :  { %504 = vsyncadd [#allocation3], 4294967040 }
  0x36   :  { %505 = dma.done.wait [#allocation6], 2048  }
  0x37   :  { %506 = vsyncadd [#allocation6], 4294965248  ;;  %v516_v0 = vmov 0.0   ;;  %vm517_vm0 = vmmov 0   ;;  %v399_v1 = vld [vmem:[#allocation5] sm:$0xff]   ;;  %v400_v2 = vld [vmem:[#allocation5 + $0x8] sm:$0xff]  }
  0x38   :  { %349 = vmatprep.subr.bf16.mxu0 %v516_v0  ;;  %365 = vmatprep.mubr.msk.bf16.mxu0 %vm517_vm0, %v516_v0  ;;  %v401_v3 = vld [vmem:[#allocation5 + $0x10] sm:$0xff]   ;;  %v407_v4 = vld [vmem:[#allocation7] sm:$0xff]   ;;  %v402_v5 = vld [vmem:[#allocation5 + $0x18] sm:$0xff]   ;;  %s518_s9 = smov [#allocation8]  }
  0x39   :  { %369 = vmatprep.subr.bf16.mxu1 %v516_v0  ;;  %385 = vmatprep.mubr.msk.bf16.mxu1 %vm517_vm0, %v516_v0  ;;  %v408_v6 = vld [vmem:[#allocation7 + $0x8] sm:$0xff]   ;;  %v403_v7 = vld [vmem:[#allocation5 + $0x20] sm:$0xff]   ;;  %v409_v8 = vld [vmem:[#allocation7 + $0x10] sm:$0xff]   ;;  %s300_s10 = sshll.u32 %s518_s9, 4  ;;  %s301_s10 = int_to_ptr.vmem [resolvable:$true] %s300_s10 }
  0x3a   :  { %350 = vmatpush3.bf16.msra.mxu0 %v399_v1  ;;  %370 = vmatpush3.bf16.msra.mxu1 %v407_v4  ;;  %v404_v9 = vld [vmem:[#allocation5 + $0x28] sm:$0xff]   ;;  %v410_v10 = vld [vmem:[#allocation7 + $0x18] sm:$0xff]   ;;  %v405_v11 = vld [vmem:[#allocation5 + $0x30] sm:$0xff]   ;;  %p486_p11 = scmp.lt.s32.totalorder %s301_s10, %s301_s10 }
  0x3b   :  { %351 = vmatprep.subr.bf16.mxu0 %v516_v0  ;;  %371 = vmatprep.subr.bf16.mxu1 %v516_v0  ;;  %v411_v12 = vld [vmem:[#allocation7 + $0x20] sm:$0xff]   ;;  %v406_v13 = vld [vmem:[#allocation5 + $0x38] sm:$0xff]   ;;  %v63_v14 = vld [vmem:[#allocation2] sm:$0xff] }
  0x3c   :  { %v64_v15 = vld [vmem:[#allocation2 + $0x8] sm:$0xff]  ;;  %v412_v16 = vld [vmem:[#allocation7 + $0x28] sm:$0xff]   ;;  %v413_v18 = vld [vmem:[#allocation7 + $0x30] sm:$0xff]  }
  0x3d   :  { %v65_v17 = vpack.c.bf16 %v64_v15, %v63_v14  ;;  %v414_v19 = vld [vmem:[#allocation7 + $0x38] sm:$0xff]   ;;  %v313_v20 = vld [vmem:[%s617_s2] ss:$0 sm:$0xff]  ;;  %s481_s2 = scalar_lea.vmem %s301_s10, 256 }
  0x3e   :  { %352 = vmatpush3.bf16.msra.mxu0 %v400_v2  ;;  %372 = vmatpush3.bf16.msra.mxu1 %v408_v6  ;;  %v322_v30 = vld [vmem:[%s619_s4] ss:$0 sm:$0xff]  ;;  %p482_p10 = scmp.ne.s32.totalorder %s301_s10, %s481_s2  ;;  %p487_p12 = scmp.lt.s32.totalorder %s481_s2, %s481_s2 }
  0x3f   :  { %353 = vmatprep.subr.bf16.mxu0 %v516_v0  ;;  %373 = vmatprep.subr.bf16.mxu1 %v516_v0 }
  0x40   :  { %p488_p13 = por %p487_p12, %p486_p11 }
  0x42   :  { %354 = vmatpush3.bf16.msra.mxu0 %v401_v3  ;;  %374 = vmatpush3.bf16.msra.mxu1 %v409_v8  ;;  %p489_p0 = pnand %p488_p13, %p482_p10 }
  0x43   :  { %355 = vmatprep.subr.bf16.mxu0 %v516_v0  ;;  %375 = vmatprep.subr.bf16.mxu1 %v516_v0 }
  0x46   :  { %356 = vmatpush3.bf16.msra.mxu0 %v402_v5  ;;  %376 = vmatpush3.bf16.msra.mxu1 %v410_v10 }
  0x47   :  { %357 = vmatprep.subr.bf16.mxu0 %v516_v0  ;;  %377 = vmatprep.subr.bf16.mxu1 %v516_v0 }
  0x4a   :  { %358 = vmatpush3.bf16.msra.mxu0 %v403_v7  ;;  %378 = vmatpush3.bf16.msra.mxu1 %v411_v12 }
  0x4b   :  { %359 = vmatprep.subr.bf16.mxu0 %v516_v0  ;;  %379 = vmatprep.subr.bf16.mxu1 %v516_v0 }
  0x4e   :  { %360 = vmatpush3.bf16.msra.mxu0 %v404_v9  ;;  %380 = vmatpush3.bf16.msra.mxu1 %v412_v16 }
  0x4f   :  { %361 = vmatprep.subr.bf16.mxu0 %v516_v0  ;;  %381 = vmatprep.subr.bf16.mxu1 %v516_v0 }
  0x52   :  { %362 = vmatpush3.bf16.msra.mxu0 %v405_v11  ;;  %382 = vmatpush3.bf16.msra.mxu1 %v413_v18 }
  0x53   :  { %363 = vmatprep.subr.bf16.mxu0 %v516_v0  ;;  %383 = vmatprep.subr.bf16.mxu1 %v516_v0 }
  0x56   :  { %364 = vmatpush3.bf16.msra.mxu0 %v406_v13  ;;  %384 = vmatpush3.bf16.msra.mxu1 %v414_v19 }
  0x59   :  { %366 = vmatmul.mubr.bf16.vlgmr.msra.gmra.mrb[0].mxu0 %v65_v17 }
 0x12c   :  { %v171_v21 = vpop.f32.mrb[0].mxu0 }
 0x12d   :  { %v172_v22 = vadd.f32 %v313_v20, %v171_v21  ;;  %v367_v23 = vpop.f32.mrb[1].mxu0 }
 0x12e   :  { %v174_v24 = vpop.f32.mrb[2].mxu0 }
 0x12f   :  { %v175_v25 = vadd.f32 %v313_v20, %v174_v24  ;;  %v368_v26 = vpop.f32.mrb[3].mxu0  ;;  %v178_v27 = vmax.f32 %v172_v22, 0.0 }
 0x131   :  { %v179_v28 = vmax.f32 %v175_v25, 0.0 }
 0x133   :  { %v180_v29 = vpack.c.bf16 %v179_v28, %v178_v27 }
 0x135   :  { %386 = vmatmul.mubr.bf16.vlgmr.msra.gmra.mrb[0].mxu1 %v180_v29 }
 0x208   :  { %v286_v31 = vpop.f32.mrb[0].mxu1 }
 0x209   :  { %v287_v32 = vadd.f32 %v322_v30, %v286_v31  ;;  %v387_v33 = vpop.f32.mrb[1].mxu1 }
 0x20a   :  { %v289_v34 = vpop.f32.mrb[2].mxu1 }
 0x20b   :  { %293 = vst [vmem:[#allocation8] sm:$0xff] %v287_v32  ;;  %v290_v35 = vadd.f32 %v322_v30, %v289_v34  ;;  %v388_v36 = vpop.f32.mrb[3].mxu1 }
 0x20d   :  { %294 = vst [vmem:[#allocation8 + $0x8] sm:$0xff] %v290_v35 }
 0x20e   :  { %492 = shalt.err (!%p489_p0)
}
 0x20f   :  { %s493_s12 = scalar_lea.hbm %s620_s5, 256 }
 0x210   :  { %p494_p1 = scmp.ne.s32.totalorder %s620_s5, %s493_s12  ;;  %p497_p2 = scmp.lt.u32.totalorder %s493_s12, %s620_s5 }
 0x212   :  { %p499_p3 = pnand %p497_p2, %p494_p1 }
 0x214   :  { %502 = shalt.err (!%p499_p3)
}
 0x215   :  { %306 = dma.vmem_to_hbm [thread:$0]  %s301_s10, 256, %s620_s5, [#allocation4], %s513_s1, %s513_s1, %s514_s17  }
 0x216   :  { %507 = dma.done.wait [#allocation4], 256  }
 0x217   :  { %508 = vsyncadd [#allocation4], 4294967040 }
 0x218   :  { %310 = vsyncpa [#allocation3], 1 }
 0x219   :  { %311 = vsyncpa [#allocation6], 1 }
 0x21a   :  { %312 = vsyncpa [#allocation4], 1 }

</bundles_post_ra>
